<compile_context>
chip_gen: v7x
topology: tpu7x:2x2x1
jax: 0.10.0
libtpu: 0.0.40
codegen_flags: <defaults>
</compile_context>

<pallas_src>
import jax
import jax.numpy as jnp
from jax.experimental import pallas as pl
from jax.experimental.pallas import tpu as pltpu

HIDDEN = 256


def _round_up(x, m):
    return ((x + m - 1) // m) * m


def _mlp_kernel(x_ref, w1_ref, b1_ref, w2_ref, b2_ref, w3_ref, b3_ref,
                o_ref, h1_ref, h2_ref):
    # Layer 1: cast f32 obs -> bf16 in-register (VPU; MXU is the binding unit),
    # (tile, in_dim) @ (in_dim, 256) with f32 accumulation, f32 bias + ReLU,
    # restaged as bf16 in VMEM scratch.
    x = x_ref[...].astype(jnp.bfloat16)
    h1 = jnp.dot(x, w1_ref[...], preferred_element_type=jnp.float32) + b1_ref[...]
    h1_ref[...] = jnp.maximum(h1, 0.0).astype(h1_ref.dtype)

    # Layer 2: (tile, 256) @ (256, 256), f32 accumulate, f32 bias + ReLU, bf16 restage.
    h2 = jnp.dot(h1_ref[...], w2_ref[...], preferred_element_type=jnp.float32) + b2_ref[...]
    h2_ref[...] = jnp.maximum(h2, 0.0).astype(h2_ref.dtype)

    # Layer 3: (tile, 256) @ (256, out_dim), stored at true output width
    # (masked vst, but far fewer HBM write bytes than a 128-lane padded f32 slab).
    o_ref[...] = jnp.dot(h2_ref[...], w3_ref[...],
                         preferred_element_type=jnp.float32) + b3_ref[...]


def prepare_params(params):
    """One-time conversion to kernel-ready dtypes: bf16 weights, f32 (1, N) biases."""
    return {
        "w1": params["w1"].astype(jnp.bfloat16),
        "b1": params["b1"].astype(jnp.float32),
        "w2": params["w2"].astype(jnp.bfloat16),
        "b2": params["b2"].astype(jnp.float32),
        "w3": params["w3"].astype(jnp.bfloat16),
        "b3": params["b3"].astype(jnp.float32),
    }


def feedforward_nn(obs, params, *, batch_tile=None):
    """Forward pass of FeedForwardNN.

    obs:    (B, in_dim) float32
    params: dict with w1 (in,256), b1 (1,256), w2 (256,256), b2 (1,256),
            w3 (256,out), b3 (1,out) -- weights stored transposed (fan_in, fan_out),
            equivalent to PyTorch x @ W.T + b. Pass through prepare_params() once to
            avoid per-call dtype conversion (casts below are then no-ops).
    Returns (B, out_dim) float32.
    """
    w1 = params["w1"] if params["w1"].dtype == jnp.bfloat16 else params["w1"].astype(jnp.bfloat16)
    w2 = params["w2"] if params["w2"].dtype == jnp.bfloat16 else params["w2"].astype(jnp.bfloat16)
    w3 = params["w3"] if params["w3"].dtype == jnp.bfloat16 else params["w3"].astype(jnp.bfloat16)
    b1 = params["b1"] if params["b1"].dtype == jnp.float32 else params["b1"].astype(jnp.float32)
    b2 = params["b2"] if params["b2"].dtype == jnp.float32 else params["b2"].astype(jnp.float32)
    b3 = params["b3"] if params["b3"].dtype == jnp.float32 else params["b3"].astype(jnp.float32)

    B, in_dim = obs.shape
    out_dim = w3.shape[1]

    # Batch tiling:
    #  - small batches (latency path): whole batch in a single grid step;
    #  - large batches (throughput path): tiles up to 2048 rows to amortize the
    #    ~0.35 us per-grid-step overhead, but capped so the grid keeps >= 2 steps
    #    (the "parallel" axis is what occupies v7x's 2 TensorCores).
    if batch_tile is None:
        if B < 256:
            batch_tile = _round_up(max(B, 8), 8)
        else:
            batch_tile = min(2048, _round_up(-(-B // 2), 8))
    assert batch_tile % 8 == 0, "batch_tile must be a multiple of 8 (sublane)"

    b_pad = _round_up(B, batch_tile)
    grid = (b_pad // batch_tile,)

    # Only row padding of raw f32 obs when B isn't a tile multiple; no dtype prepass,
    # no lane padding (block last dim == full array dim is legal).
    obs_p = obs if b_pad == B else jnp.pad(obs, ((0, b_pad - B), (0, 0)))

    out = pl.pallas_call(
        _mlp_kernel,
        out_shape=jax.ShapeDtypeStruct((b_pad, out_dim), jnp.float32),
        grid_spec=pltpu.PrefetchScalarGridSpec(
            num_scalar_prefetch=0,
            grid=grid,
            in_specs=[
                pl.BlockSpec((batch_tile, in_dim), lambda i: (i, 0)),  # obs tile (f32)
                pl.BlockSpec((in_dim, HIDDEN), lambda i: (0, 0)),      # w1 (bf16)
                pl.BlockSpec((1, HIDDEN), lambda i: (0, 0)),           # b1 (f32)
                pl.BlockSpec((HIDDEN, HIDDEN), lambda i: (0, 0)),      # w2 (bf16)
                pl.BlockSpec((1, HIDDEN), lambda i: (0, 0)),           # b2 (f32)
                pl.BlockSpec((HIDDEN, out_dim), lambda i: (0, 0)),     # w3 (bf16)
                pl.BlockSpec((1, out_dim), lambda i: (0, 0)),          # b3 (f32)
            ],
            out_specs=pl.BlockSpec((batch_tile, out_dim), lambda i: (i, 0)),
            scratch_shapes=[
                pltpu.VMEM((batch_tile, HIDDEN), jnp.bfloat16),  # h1 staging
                pltpu.VMEM((batch_tile, HIDDEN), jnp.bfloat16),  # h2 staging
            ],
        ),
        compiler_params=pltpu.CompilerParams(
            dimension_semantics=("parallel",),
        ),
    )(obs_p, w1, b1, w2, b2, w3, b3)

    return out if b_pad == B else out[:B]


def init_params(key, in_dim, out_dim):
    """Init mimicking PyTorch nn.Linear default (U[-1/sqrt(fan_in), 1/sqrt(fan_in)]).

    Weights stored transposed, shape (fan_in, fan_out), so the kernel does x @ W.
    """
    keys = jax.random.split(key, 6)

    def linear(kw, kb, fan_in, fan_out):
        bound = 1.0 / jnp.sqrt(jnp.float32(fan_in))
        w = jax.random.uniform(kw, (fan_in, fan_out), jnp.float32, -bound, bound)
        b = jax.random.uniform(kb, (1, fan_out), jnp.float32, -bound, bound)
        return w, b

    w1, b1 = linear(keys[0], keys[1], in_dim, HIDDEN)
    w2, b2 = linear(keys[2], keys[3], HIDDEN, HIDDEN)
    w3, b3 = linear(keys[4], keys[5], HIDDEN, out_dim)
    return {"w1": w1, "b1": b1, "w2": w2, "b2": b2, "w3": w3, "b3": b3}


def _reference_f32(obs, p):
    h1 = jnp.maximum(obs @ p["w1"] + p["b1"], 0.0)
    h2 = jnp.maximum(h1 @ p["w2"] + p["b2"], 0.0)
    return h2 @ p["w3"] + p["b3"]


def _reference_bf16(obs, p):
    # Mirrors the kernel's numerics: bf16 operands, f32 accumulation, f32 bias/ReLU,
    # bf16 restaging of hidden activations.
    x = obs.astype(jnp.bfloat16)
    w1 = p["w1"].astype(jnp.bfloat16)
    w2 = p["w2"].astype(jnp.bfloat16)
    w3 = p["w3"].astype(jnp.bfloat16)
    b1 = p["b1"].astype(jnp.float32)
    b2 = p["b2"].astype(jnp.float32)
    b3 = p["b3"].astype(jnp.float32)
    h1 = jnp.maximum(jnp.dot(x, w1, preferred_element_type=jnp.float32) + b1, 0.0)
    h1 = h1.astype(jnp.bfloat16)
    h2 = jnp.maximum(jnp.dot(h1, w2, preferred_element_type=jnp.float32) + b2, 0.0)
    h2 = h2.astype(jnp.bfloat16)
    return jnp.dot(h2, w3, preferred_element_type=jnp.float32) + b3


if __name__ == "__main__":
    key = jax.random.PRNGKey(0)
    k_obs, k_params, k_obs_big = jax.random.split(key, 3)

    # Small case (single-step latency path).
    batch, in_dim, out_dim = 8, 16, 4   # in_dim ~ obs dim, out_dim ~ action dim
    obs = jax.random.normal(k_obs, (batch, in_dim), dtype=jnp.float32)
    params = init_params(k_params, in_dim, out_dim)
    kparams = prepare_params(params)   # one-time bf16/f32 conversion

    out = jax.block_until_ready(feedforward_nn(obs, kparams))
    assert out.shape == (batch, out_dim)

    ref_bf16 = _reference_bf16(obs, params)
    ref_f32 = _reference_f32(obs, params)
    assert jnp.allclose(out, ref_bf16, atol=1e-3, rtol=1e-3), "mismatch vs bf16-mirror reference"
    assert jnp.allclose(out, ref_f32, atol=3e-2, rtol=3e-2), "mismatch vs f32 reference"

    # Larger batch: exercises the >=2-step parallel grid and row padding of the last tile.
    batch_big = 520  # not a multiple of the tile
    obs_big = jax.random.normal(k_obs_big, (batch_big, in_dim), dtype=jnp.float32)
    out_big = jax.block_until_ready(feedforward_nn(obs_big, kparams))
    assert out_big.shape == (batch_big, out_dim)
    ref_big = _reference_bf16(obs_big, params)
    assert jnp.allclose(out_big, ref_big, atol=1e-3, rtol=1e-3), "mismatch (big batch)"

    print("KERNEL_OK")
</pallas_src>

<mosaic_0001>
module attributes {stable_mosaic.version = 11 : i64} {
  func.func @_mlp_kernel(%arg0: i32, %arg1: memref<8x16xf32, #tpu.memory_space<vmem>>, %arg2: memref<16x256xbf16, #tpu.memory_space<vmem>>, %arg3: memref<1x256xf32, #tpu.memory_space<vmem>>, %arg4: memref<256x256xbf16, #tpu.memory_space<vmem>>, %arg5: memref<1x256xf32, #tpu.memory_space<vmem>>, %arg6: memref<256x4xbf16, #tpu.memory_space<vmem>>, %arg7: memref<1x4xf32, #tpu.memory_space<vmem>>, %arg8: memref<8x4xf32, #tpu.memory_space<vmem>>, %arg9: memref<8x256xbf16, #tpu.memory_space<vmem>>, %arg10: memref<8x256xbf16, #tpu.memory_space<vmem>>) attributes {dimension_semantics = [#tpu.dimension_semantics<parallel>], iteration_bounds = array<i64: 1>, scalar_prefetch = 0 : i64, scratch_operands = 2 : i64, tpu.core_type = #tpu.core_type<tc>, window_params = [{transform_indices = @transform_0, window_bounds = array<i64: 8, 16>}, {pipeline_mode = #tpu.pipeline_mode<synchronous>, transform_indices = @transform_1, window_bounds = array<i64: 16, 256>}, {pipeline_mode = #tpu.pipeline_mode<synchronous>, transform_indices = @transform_2, window_bounds = array<i64: 1, 256>}, {pipeline_mode = #tpu.pipeline_mode<synchronous>, transform_indices = @transform_3, window_bounds = array<i64: 256, 256>}, {pipeline_mode = #tpu.pipeline_mode<synchronous>, transform_indices = @transform_4, window_bounds = array<i64: 1, 256>}, {pipeline_mode = #tpu.pipeline_mode<synchronous>, transform_indices = @transform_5, window_bounds = array<i64: 256, 4>}, {pipeline_mode = #tpu.pipeline_mode<synchronous>, transform_indices = @transform_6, window_bounds = array<i64: 1, 4>}, {transform_indices = @transform_7, window_bounds = array<i64: 8, 4>}]} {
    %c0 = arith.constant 0 : index
    %c0_0 = arith.constant 0 : index
    %0 = vector.load %arg1[%c0, %c0_0] : memref<8x16xf32, #tpu.memory_space<vmem>>, vector<8x16xf32>
    %1 = arith.truncf %0 : vector<8x16xf32> to vector<8x16xbf16>
    %c0_1 = arith.constant 0 : index
    %c0_2 = arith.constant 0 : index
    %2 = vector.load %arg2[%c0_1, %c0_2] : memref<16x256xbf16, #tpu.memory_space<vmem>>, vector<16x256xbf16>
    %cst = arith.constant dense<0.000000e+00> : vector<8x256xf32>
    %3 = tpu.matmul %1, %2, %cst {dimension_numbers = #tpu.dot_dimension_numbers<[1], [0], [0], [1], [0, 0, 1, 1], [], []>} : vector<8x16xbf16>, vector<16x256xbf16>, vector<8x256xf32> -> vector<8x256xf32>
    %c0_3 = arith.constant 0 : index
    %c0_4 = arith.constant 0 : index
    %4 = vector.load %arg3[%c0_3, %c0_4] : memref<1x256xf32, #tpu.memory_space<vmem>>, vector<1x256xf32>
    %5 = vector.broadcast %4 : vector<1x256xf32> to vector<8x256xf32>
    %6 = arith.addf %3, %5 : vector<8x256xf32>
    %cst_5 = arith.constant 0.000000e+00 : f32
    %7 = vector.broadcast %cst_5 : f32 to vector<8x256xf32>
    %8 = arith.maximumf %6, %7 : vector<8x256xf32>
    %9 = arith.truncf %8 : vector<8x256xf32> to vector<8x256xbf16>
    %c0_6 = arith.constant 0 : index
    %c0_7 = arith.constant 0 : index
    %10 = vector.load %arg9[%c0_6, %c0_7] : memref<8x256xbf16, #tpu.memory_space<vmem>>, vector<8x256xbf16>
    tpu.vector_store %arg9[%c0_6, %c0_7], %9 {strides = array<i32>} : memref<8x256xbf16, #tpu.memory_space<vmem>>, vector<8x256xbf16>,
    %c0_8 = arith.constant 0 : index
    %c0_9 = arith.constant 0 : index
    %11 = vector.load %arg9[%c0_8, %c0_9] : memref<8x256xbf16, #tpu.memory_space<vmem>>, vector<8x256xbf16>
    %c0_10 = arith.constant 0 : index
    %c0_11 = arith.constant 0 : index
    %12 = vector.load %arg4[%c0_10, %c0_11] : memref<256x256xbf16, #tpu.memory_space<vmem>>, vector<256x256xbf16>
    %cst_12 = arith.constant dense<0.000000e+00> : vector<8x256xf32>
    %13 = tpu.matmul %11, %12, %cst_12 {dimension_numbers = #tpu.dot_dimension_numbers<[1], [0], [0], [1], [0, 0, 1, 1], [], []>} : vector<8x256xbf16>, vector<256x256xbf16>, vector<8x256xf32> -> vector<8x256xf32>
    %c0_13 = arith.constant 0 : index
    %c0_14 = arith.constant 0 : index
    %14 = vector.load %arg5[%c0_13, %c0_14] : memref<1x256xf32, #tpu.memory_space<vmem>>, vector<1x256xf32>
    %15 = vector.broadcast %14 : vector<1x256xf32> to vector<8x256xf32>
    %16 = arith.addf %13, %15 : vector<8x256xf32>
    %cst_15 = arith.constant 0.000000e+00 : f32
    %17 = vector.broadcast %cst_15 : f32 to vector<8x256xf32>
    %18 = arith.maximumf %16, %17 : vector<8x256xf32>
    %19 = arith.truncf %18 : vector<8x256xf32> to vector<8x256xbf16>
    %c0_16 = arith.constant 0 : index
    %c0_17 = arith.constant 0 : index
    %20 = vector.load %arg10[%c0_16, %c0_17] : memref<8x256xbf16, #tpu.memory_space<vmem>>, vector<8x256xbf16>
    tpu.vector_store %arg10[%c0_16, %c0_17], %19 {strides = array<i32>} : memref<8x256xbf16, #tpu.memory_space<vmem>>, vector<8x256xbf16>,
    %c0_18 = arith.constant 0 : index
    %c0_19 = arith.constant 0 : index
    %21 = vector.load %arg10[%c0_18, %c0_19] : memref<8x256xbf16, #tpu.memory_space<vmem>>, vector<8x256xbf16>
    %c0_20 = arith.constant 0 : index
    %c0_21 = arith.constant 0 : index
    %22 = vector.load %arg6[%c0_20, %c0_21] : memref<256x4xbf16, #tpu.memory_space<vmem>>, vector<256x4xbf16>
    %cst_22 = arith.constant dense<0.000000e+00> : vector<8x4xf32>
    %23 = tpu.matmul %21, %22, %cst_22 {dimension_numbers = #tpu.dot_dimension_numbers<[1], [0], [0], [1], [0, 0, 1, 1], [], []>} : vector<8x256xbf16>, vector<256x4xbf16>, vector<8x4xf32> -> vector<8x4xf32>
    %c0_23 = arith.constant 0 : index
    %c0_24 = arith.constant 0 : index
    %24 = vector.load %arg7[%c0_23, %c0_24] : memref<1x4xf32, #tpu.memory_space<vmem>>, vector<1x4xf32>
    %25 = vector.broadcast %24 : vector<1x4xf32> to vector<8x4xf32>
    %26 = arith.addf %23, %25 : vector<8x4xf32>
    %c0_25 = arith.constant 0 : index
    %c0_26 = arith.constant 0 : index
    %27 = vector.load %arg8[%c0_25, %c0_26] : memref<8x4xf32, #tpu.memory_space<vmem>>, vector<8x4xf32>
    tpu.vector_store %arg8[%c0_25, %c0_26], %26 {strides = array<i32>} : memref<8x4xf32, #tpu.memory_space<vmem>>, vector<8x4xf32>,
    return
  }
  func.func @transform_0(%arg0: i32) -> (i32, i32) {
    %c0_i32 = arith.constant 0 : i32
    %c0_i32_0 = arith.constant 0 : i32
    return %arg0, %c0_i32 : i32, i32
  }
  func.func @transform_1(%arg0: i32) -> (i32, i32) {
    %c0_i32 = arith.constant 0 : i32
    %c0_i32_0 = arith.constant 0 : i32
    %c0_i32_1 = arith.constant 0 : i32
    return %c0_i32, %c0_i32_0 : i32, i32
  }
  func.func @transform_2(%arg0: i32) -> (i32, i32) {
    %c0_i32 = arith.constant 0 : i32
    %c0_i32_0 = arith.constant 0 : i32
    %c0_i32_1 = arith.constant 0 : i32
    return %c0_i32, %c0_i32_0 : i32, i32
  }
  func.func @transform_3(%arg0: i32) -> (i32, i32) {
    %c0_i32 = arith.constant 0 : i32
    %c0_i32_0 = arith.constant 0 : i32
    %c0_i32_1 = arith.constant 0 : i32
    return %c0_i32, %c0_i32_0 : i32, i32
  }
  func.func @transform_4(%arg0: i32) -> (i32, i32) {
    %c0_i32 = arith.constant 0 : i32
    %c0_i32_0 = arith.constant 0 : i32
    %c0_i32_1 = arith.constant 0 : i32
    return %c0_i32, %c0_i32_0 : i32, i32
  }
  func.func @transform_5(%arg0: i32) -> (i32, i32) {
    %c0_i32 = arith.constant 0 : i32
    %c0_i32_0 = arith.constant 0 : i32
    %c0_i32_1 = arith.constant 0 : i32
    return %c0_i32, %c0_i32_0 : i32, i32
  }
  func.func @transform_6(%arg0: i32) -> (i32, i32) {
    %c0_i32 = arith.constant 0 : i32
    %c0_i32_0 = arith.constant 0 : i32
    %c0_i32_1 = arith.constant 0 : i32
    return %c0_i32, %c0_i32_0 : i32, i32
  }
  func.func @transform_7(%arg0: i32) -> (i32, i32) {
    %c0_i32 = arith.constant 0 : i32
    %c0_i32_0 = arith.constant 0 : i32
    return %arg0, %c0_i32 : i32, i32
  }
}

</mosaic_0001>

<bundles_post_ra>
// kernel: tpu_custom_call.1
= control target key start
LH: loop header
LB: loop body
LE: loop exit
PB: predicated region body
PF: predicated region fallthrough
CT: control target
= control target key end

     0   :  { %12 = vsyncpa [#allocation5], 0  ;;  %s758_s24 = smov [#allocation4]   ;;  %s883_s0 = inlined_call_operand.vmem [shape: f32[8,16], index: 0, kind: input, shape index: {}]   ;;  %s884_s1 = inlined_call_operand.vmem [shape: bf16[16,256], index: 1, kind: input, shape index: {}]   ;;  %s885_s2 = inlined_call_operand.vmem [shape: f32[1,256], index: 2, kind: input, shape index: {}]   ;;  %s886_s3 = inlined_call_operand.hbm [shape: bf16[256,256], index: 3, kind: input, shape index: {}]   ;;  %s887_s4 = inlined_call_operand.vmem [shape: f32[1,256], index: 4, kind: input, shape index: {}]   ;;  %s888_s5 = inlined_call_operand.vmem [shape: bf16[256,4], index: 5, kind: input, shape index: {}]   ;;  %s889_s6 = inlined_call_operand.vmem [shape: f32[1,4], index: 6, kind: input, shape index: {}]   ;;  %s890_s7 = inlined_call_operand.vmem [shape: f32[8,4], index: 7, kind: output, shape index: {}]  }
   0x1   :  { %s24_s25 = sshll.u32 %s758_s24, 4  ;;  %s734_s28 = scalar_lea.hbm %s886_s3, 4096  ;;  %s25_s25 = int_to_ptr.vmem [resolvable:$true] %s24_s25 }
   0x2   :  { %p735_p0 = scmp.ne.s32.totalorder %s886_s3, %s734_s28  ;;  %p738_p1 = scmp.lt.u32.totalorder %s734_s28, %s886_s3 }
   0x4   :  { %p740_p2 = pnand %p738_p1, %p735_p0 }
   0x6   :  { %743 = shalt.err (!%p740_p2)
}
   0x7   :  { %s744_s10 = scalar_lea.vmem %s25_s25, 4096  ;;  %p749_p4 = scmp.lt.s32.totalorder %s25_s25, %s25_s25 }
   0x8   :  { %p745_p3 = scmp.ne.s32.totalorder %s25_s25, %s744_s10  ;;  %p750_p5 = scmp.lt.s32.totalorder %s744_s10, %s744_s10 }
   0xa   :  { %p751_p6 = por %p750_p5, %p749_p4 }
   0xc   :  { %p752_p7 = pnand %p751_p6, %p745_p3 }
   0xe   :  { %755 = shalt.err (!%p752_p7)
}
   0xf   :  { %s759_s11 = smov 128   ;;  %s760_s12 = smov 8  }
  0x10   :  { %30 = dma.hbm_to_vmem [thread:$0]  %s886_s3, 4096, %s25_s25, [#allocation5], %s759_s11, %s759_s11, %s760_s12  }
  0x11   :  { %756 = dma.done.wait [#allocation5], 4096  }
  0x12   :  { %757 = vsyncadd [#allocation5], 4294963200  ;;  %v761_v0 = vmov 0   ;;  %v667_v1 = vld [vmem:[%s884_s1 + $0x4] ss:$8 sps:$4 sm:$0xff]   ;;  %vm67_vm0 = vcmask 130048   ;;  %v47_v49 = vlaneseq }
  0x13   :  { %103 = vmatprep.mubr.bf16.mxu0 %v761_v0  ;;  %v669_v2 = vld [vmem:[%s884_s1] ss:$8 sps:$4 sm:$0xff]   ;;  %71 = vmatprep.subr.bf16.mxu0 %v667_v1  ;;  %v670_v5 = vld [vmem:[#allocation4 + $0x4] ss:$8 sps:$4 sm:$0xff]   ;;  %v673_v7 = vld [vmem:[#allocation4 + $0x14] ss:$8 sps:$4 sm:$0xff]  }
  0x14   :  { %v41_v3 = vld [vmem:[%s883_s0] sm:$0xff]  ;;  %72 = vmatpush1.bf16.msra.mxu0 %v669_v2  ;;  %335 = vmatprep.subr.bf16.mxu1 %v670_v5  ;;  %v675_v8 = vld [vmem:[#allocation4 + $0x10] ss:$8 sps:$4 sm:$0xff]   ;;  %v679_v11 = vld [vmem:[#allocation4 + $0x34] ss:$8 sps:$4 sm:$0xff]   ;;  %v48_v50 = vshrl.u32 %v47_v49, 7 }
  0x15   :  { %v42_v4 = vpack.c.bf16 %v41_v3, %v41_v3  ;;  %v672_v6 = vld [vmem:[#allocation4] ss:$8 sps:$4 sm:$0xff]   ;;  %v676_v9 = vld [vmem:[#allocation4 + $0x24] ss:$8 sps:$4 sm:$0xff]   ;;  %v681_v12 = vld [vmem:[#allocation4 + $0x30] ss:$8 sps:$4 sm:$0xff]  }
  0x16   :  { %336 = vmatpush1.bf16.msra.mxu1 %v672_v6  ;;  %v678_v10 = vld [vmem:[#allocation4 + $0x20] ss:$8 sps:$4 sm:$0xff]   ;;  %v682_v13 = vld [vmem:[#allocation4 + $0x44] ss:$8 sps:$4 sm:$0xff]   ;;  %v685_v15 = vld [vmem:[#allocation4 + $0x54] ss:$8 sps:$4 sm:$0xff]  }
  0x17   :  { %579 = vmatmul.mubr.msk.bf16.vlgmr.msra.gmra.mrb[0].mxu0 %vm67_vm0, %v42_v4  ;;  %337 = vmatprep.subr.bf16.mxu1 %v673_v7  ;;  %v684_v14 = vld [vmem:[#allocation4 + $0x40] ss:$8 sps:$4 sm:$0xff]   ;;  %v687_v16 = vld [vmem:[#allocation4 + $0x50] ss:$8 sps:$4 sm:$0xff]   ;;  %v688_v17 = vld [vmem:[#allocation4 + $0x64] ss:$8 sps:$4 sm:$0xff]  }
  0x18   :  { %v690_v18 = vld [vmem:[#allocation4 + $0x60] ss:$8 sps:$4 sm:$0xff]   ;;  %v691_v19 = vld [vmem:[#allocation4 + $0x74] ss:$8 sps:$4 sm:$0xff]   ;;  %v693_v20 = vld [vmem:[#allocation4 + $0x70] ss:$8 sps:$4 sm:$0xff]  }
  0x19   :  { %v694_v21 = vld [vmem:[#allocation4 + $0x84] ss:$8 sps:$4 sm:$0xff]   ;;  %v696_v22 = vld [vmem:[#allocation4 + $0x80] ss:$8 sps:$4 sm:$0xff]   ;;  %v697_v23 = vld [vmem:[#allocation4 + $0x94] ss:$8 sps:$4 sm:$0xff]  }
  0x1a   :  { %338 = vmatpush1.bf16.msra.mxu1 %v675_v8  ;;  %v699_v24 = vld [vmem:[#allocation4 + $0x90] ss:$8 sps:$4 sm:$0xff]   ;;  %v700_v25 = vld [vmem:[#allocation4 + $0xa4] ss:$8 sps:$4 sm:$0xff]   ;;  %v702_v26 = vld [vmem:[#allocation4 + $0xa0] ss:$8 sps:$4 sm:$0xff]  }
  0x1b   :  { %339 = vmatprep.subr.bf16.mxu1 %v676_v9  ;;  %v703_v27 = vld [vmem:[#allocation4 + $0xb4] ss:$8 sps:$4 sm:$0xff]   ;;  %v705_v28 = vld [vmem:[#allocation4 + $0xb0] ss:$8 sps:$4 sm:$0xff]   ;;  %v706_v29 = vld [vmem:[#allocation4 + $0xc4] ss:$8 sps:$4 sm:$0xff]  }
  0x1c   :  { %v708_v30 = vld [vmem:[#allocation4 + $0xc0] ss:$8 sps:$4 sm:$0xff]   ;;  %v709_v31 = vld [vmem:[#allocation4 + $0xd4] ss:$8 sps:$4 sm:$0xff]   ;;  %v711_v32 = vld [vmem:[#allocation4 + $0xd0] ss:$8 sps:$4 sm:$0xff]  }
  0x1d   :  { %v712_v33 = vld [vmem:[#allocation4 + $0xe4] ss:$8 sps:$4 sm:$0xff]   ;;  %v714_v34 = vld [vmem:[#allocation4 + $0xe0] ss:$8 sps:$4 sm:$0xff]   ;;  %v715_v35 = vld [vmem:[#allocation4 + $0xf4] ss:$8 sps:$4 sm:$0xff]  }
  0x1e   :  { %340 = vmatpush1.bf16.msra.mxu1 %v678_v10  ;;  %v717_v36 = vld [vmem:[#allocation4 + $0xf0] ss:$8 sps:$4 sm:$0xff]   ;;  %v718_v37 = vld [vmem:[%s888_s5 + $0x40] sm:$0xff]   ;;  %v720_v39 = vld [vmem:[%s888_s5 + $0x48] sm:$0xff]   ;;  %v49_v51 = vsub.s32 0, %v48_v50  ;;  %v53_v53 = vsub.s32 1, %v48_v50 }
  0x1f   :  { %341 = vmatprep.subr.bf16.mxu1 %v679_v11  ;;  %v719_v38 = vld [vmem:[%s888_s5] sm:$0xff]   ;;  %641 = vmatprep.subr.bf16.mxu0 %v718_v37  ;;  %v721_v40 = vld [vmem:[%s888_s5 + $0x8] sm:$0xff]   ;;  %v722_v41 = vld [vmem:[%s888_s5 + $0x50] sm:$0xff]   ;;  %vm570_vm1 = vcmask 31744  }
  0x20   :  { %642 = vmatpush3.bf16.msra.mxu0 %v719_v38  ;;  %v723_v42 = vld [vmem:[%s888_s5 + $0x10] sm:$0xff]   ;;  %v724_v43 = vld [vmem:[%s888_s5 + $0x58] sm:$0xff]   ;;  %v726_v45 = vld [vmem:[%s888_s5 + $0x60] sm:$0xff]  }
  0x21   :  { %643 = vmatprep.subr.bf16.mxu0 %v720_v39  ;;  %v725_v44 = vld [vmem:[%s888_s5 + $0x18] sm:$0xff]   ;;  %v727_v46 = vld [vmem:[%s888_s5 + $0x20] sm:$0xff]   ;;  %v728_v47 = vld [vmem:[%s888_s5 + $0x68] sm:$0xff]  }
  0x22   :  { %342 = vmatpush1.bf16.msra.mxu1 %v681_v12  ;;  %v729_v48 = vld [vmem:[%s888_s5 + $0x28] sm:$0xff]   ;;  %v45_v52 = vld [vmem:[%s885_s2] sm:$0x3]  ;;  %v730_v2 = vld [vmem:[%s888_s5 + $0x70] sm:$0xff]  }
  0x23   :  { %343 = vmatprep.subr.bf16.mxu1 %v682_v13  ;;  %v50_v54 = vrot.slane %v45_v52, %v49_v51  ;;  %v54_v55 = vrot.slane %v45_v52, %v53_v53  ;;  %v731_v3 = vld [vmem:[%s888_s5 + $0x30] sm:$0xff]   ;;  %v732_v4 = vld [vmem:[%s888_s5 + $0x78] sm:$0xff]   ;;  %v156_v6 = vld [vmem:[%s887_s4] sm:$0x3] }
  0x24   :  { %644 = vmatpush3.bf16.msra.mxu0 %v721_v40  ;;  %v733_v5 = vld [vmem:[%s888_s5 + $0x38] sm:$0xff]   ;;  %v161_v7 = vrot.slane %v156_v6, %v49_v51  ;;  %v165_v8 = vrot.slane %v156_v6, %v53_v53 }
  0x25   :  { %645 = vmatprep.subr.bf16.mxu0 %v722_v41 }
  0x26   :  { %344 = vmatpush1.bf16.msra.mxu1 %v684_v14 }
  0x27   :  { %345 = vmatprep.subr.bf16.mxu1 %v685_v15 }
  0x28   :  { %646 = vmatpush3.bf16.msra.mxu0 %v723_v42 }
  0x29   :  { %647 = vmatprep.subr.bf16.mxu0 %v724_v43 }
  0x2a   :  { %346 = vmatpush1.bf16.msra.mxu1 %v687_v16 }
  0x2b   :  { %347 = vmatprep.subr.bf16.mxu1 %v688_v17 }
  0x2c   :  { %648 = vmatpush3.bf16.msra.mxu0 %v725_v44 }
  0x2d   :  { %649 = vmatprep.subr.bf16.mxu0 %v726_v45 }
  0x2e   :  { %348 = vmatpush1.bf16.msra.mxu1 %v690_v18 }
  0x2f   :  { %349 = vmatprep.subr.bf16.mxu1 %v691_v19 }
  0x30   :  { %650 = vmatpush3.bf16.msra.mxu0 %v727_v46 }
  0x31   :  { %651 = vmatprep.subr.bf16.mxu0 %v728_v47 }
  0x32   :  { %350 = vmatpush1.bf16.msra.mxu1 %v693_v20  ;;  %v616_v20 = vld [vmem:[%s889_s6] ss:$0 sm:$0xff] }
  0x33   :  { %351 = vmatprep.subr.bf16.mxu1 %v694_v21 }
  0x34   :  { %652 = vmatpush3.bf16.msra.mxu0 %v729_v48 }
  0x35   :  { %653 = vmatprep.subr.bf16.mxu0 %v730_v2 }
  0x36   :  { %352 = vmatpush1.bf16.msra.mxu1 %v696_v22 }
  0x37   :  { %353 = vmatprep.subr.bf16.mxu1 %v697_v23 }
  0x38   :  { %654 = vmatpush3.bf16.msra.mxu0 %v731_v3 }
  0x39   :  { %655 = vmatprep.subr.bf16.mxu0 %v732_v4 }
  0x3a   :  { %354 = vmatpush1.bf16.msra.mxu1 %v699_v24 }
  0x3b   :  { %355 = vmatprep.subr.bf16.mxu1 %v700_v25 }
  0x3c   :  { %656 = vmatpush3.bf16.msra.mxu0 %v733_v5 }
  0x3e   :  { %356 = vmatpush1.bf16.msra.mxu1 %v702_v26 }
  0x3f   :  { %357 = vmatprep.subr.bf16.mxu1 %v703_v27 }
  0x42   :  { %358 = vmatpush1.bf16.msra.mxu1 %v705_v28 }
  0x43   :  { %359 = vmatprep.subr.bf16.mxu1 %v706_v29 }
  0x46   :  { %360 = vmatpush1.bf16.msra.mxu1 %v708_v30 }
  0x47   :  { %361 = vmatprep.subr.bf16.mxu1 %v709_v31 }
  0x4a   :  { %362 = vmatpush1.bf16.msra.mxu1 %v711_v32 }
  0x4b   :  { %363 = vmatprep.subr.bf16.mxu1 %v712_v33 }
  0x4e   :  { %364 = vmatpush1.bf16.msra.mxu1 %v714_v34 }
  0x4f   :  { %365 = vmatprep.subr.bf16.mxu1 %v715_v35 }
  0x52   :  { %366 = vmatpush1.bf16.msra.mxu1 %v717_v36 }
  0xea   :  { %v105_v56 = vpop.f32.mrb[0].mxu0 }
  0xeb   :  { %v106_v57 = vadd.f32 %v105_v56, %v50_v54  ;;  %v107_v58 = vpop.f32.mrb[1].mxu0 }
  0xec   :  { %v108_v59 = vadd.f32 %v107_v58, %v54_v55  ;;  %v109_v60 = vpop.f32.mrb[2].mxu0 }
  0xed   :  { %v112_v61 = vmax.f32 %v106_v57, 0.0  ;;  %v110_v62 = vpop.f32.mrb[3].mxu0 }
  0xee   :  { %v113_v63 = vmax.f32 %v108_v59, 0.0 }
  0xef   :  { %v637_v1 = vpack.c.bf16 %v112_v61, %v112_v61 }
  0xf0   :  { %v638_v0 = vpack.c.bf16 %v113_v63, %v113_v63 }
  0xf2   :  { %367 = vmatprep.mubr.bf16.mxu1 %v638_v0 }
  0xf3   :  { %368 = vmatmul.mubr.bf16.vlgmr.msra.gmra.mrb[0].mxu1 %v637_v1 }
 0x1c6   :  { %v369_v9 = vpop.f32.mrb[0].mxu1 }
 0x1c7   :  { %v370_v10 = vadd.f32 %v369_v9, %v161_v7  ;;  %v371_v11 = vpop.f32.mrb[1].mxu1 }
 0x1c8   :  { %v372_v12 = vadd.f32 %v371_v11, %v165_v8  ;;  %v373_v13 = vpop.f32.mrb[2].mxu1 }
 0x1c9   :  { %v376_v14 = vmax.f32 %v370_v10, 0.0  ;;  %v374_v15 = vpop.f32.mrb[3].mxu1 }
 0x1ca   :  { %v377_v16 = vmax.f32 %v372_v12, 0.0 }
 0x1cb   :  { %v639_v18 = vpack.c.bf16 %v376_v14, %v376_v14 }
 0x1cc   :  { %v640_v17 = vpack.c.bf16 %v377_v16, %v377_v16 }
 0x1ce   :  { %562 = vmatprep.mubr.bf16.mxu0 %v640_v17 }
 0x1cf   :  { %563 = vmatmul.mubr.bf16.vlgmr.msra.gmra.mrb[4].mxu0 %v639_v18 }
 0x2a2   :  { %v657_v19 = vpop.f32.mrb[4].mxu0 }
 0x2a3   :  { %v658_v21 = vpop.f32.mrb[5].mxu0 }
 0x2a4   :  { %v659_v22 = vadd.f32 %v658_v21, %v657_v19  ;;  %v660_v23 = vpop.f32.mrb[6].mxu0 }
 0x2a5   :  { %v661_v24 = vpop.f32.mrb[7].mxu0 }
 0x2a6   :  { %v565_v25 = vadd.f32 %v659_v22, %v616_v20 }
 0x2a8   :  { %571 = vst.msk [vmem:[%s890_s7] sm:$0xff] %vm570_vm1, %v565_v25 }
 0x2a9   :  { %576 = vsyncpa [#allocation5], 1 }

</bundles_post_ra>
